<compile_context>
chip_gen: v6e
topology: v6e:2x2x1
jax: 0.10.0
libtpu: 0.0.40
codegen_flags: <defaults>
</compile_context>

<pallas_src>
import jax
import jax.numpy as jnp
from jax.experimental import pallas as pl
from jax.experimental.pallas import tpu as pltpu

_LANE = 128                     # lane (last-dim) granule
_SUB = 8                        # sublane granule
_VMEM_BUDGET = 36 << 20         # tile-selection target (safe inside v7x's 64 MiB)
_W1_RESIDENT_BUDGET = 20 << 20  # max w1 bytes we keep VMEM-resident
_VMEM_LIMIT_CAP = 48 << 20      # scoped-VMEM cap passed to the compiler


def _round_up(x, m):
    return ((x + m - 1) // m) * m


def _classifier_kernel(x_ref, w1_ref, b1_ref, w2_ref, b2_ref, o_ref, acc_ref):
    """K-tiled fc1 (f32 accum seeded with b1) -> relu -> fc2 -> +b2 -> sigmoid."""
    k = pl.program_id(1)

    @pl.when(k == 0)
    def _():
        # Seed the accumulator with the broadcast bias (saves an epilogue add).
        acc_ref[...] = jnp.broadcast_to(b1_ref[...], acc_ref.shape)

    # Partial fc1 product for this K slab (MXU, f32 accumulation).
    acc_ref[...] += jnp.dot(x_ref[...], w1_ref[...],
                            preferred_element_type=jnp.float32)

    @pl.when(k == pl.num_programs(1) - 1)
    def _():
        h = jnp.maximum(acc_ref[...], 0.0)                         # relu (f32)
        y = jnp.dot(h.astype(w2_ref.dtype), w2_ref[...],
                    preferred_element_type=jnp.float32) + b2_ref[...]
        o_ref[...] = jax.nn.sigmoid(y).astype(o_ref.dtype)


def _vmem_footprint(block_m, block_k, Hp, Cp, itemsize, w1_bufs):
    return (2 * block_m * block_k * itemsize      # x slabs (double-buffered)
            + w1_bufs * block_k * Hp * itemsize   # w1 (resident or 2 K-slabs)
            + Hp * Cp * itemsize                  # w2 (resident)
            + 4 * (Hp + Cp)                       # biases (f32)
            + 4 * block_m * Hp                    # f32 fc1 accumulator scratch
            + 2 * 4 * block_m * Cp)               # f32 output slabs


def _select_tiles(B, Dp, Hp, Cp, itemsize):
    Bp8 = _round_up(B, _SUB)

    # Prefer a fully VMEM-resident w1: exactly one HBM pass over the weights.
    if Dp * Hp * itemsize <= _W1_RESIDENT_BUDGET:
        block_k, w1_bufs = Dp, 1
    else:
        block_k = min(Dp, 1024 if itemsize <= 2 else 512)
        w1_bufs = 2                      # K-streamed, double-buffered

    # Roofline-sized batch tile (restreamed-w1 intensity = 2*block_m/itemsize).
    tgt_m = 512 if w1_bufs == 1 else (1024 if itemsize <= 2 else 512)
    block_m = min(Bp8, _round_up(tgt_m, _SUB))

    # Shrink until the double-buffered working set fits the VMEM budget.
    while (_vmem_footprint(block_m, block_k, Hp, Cp, itemsize, w1_bufs)
           > _VMEM_BUDGET and block_m > _SUB):
        block_m = max(_SUB, _round_up(block_m // 2, _SUB))
    while (_vmem_footprint(block_m, block_k, Hp, Cp, itemsize, w1_bufs)
           > _VMEM_BUDGET and block_k > _LANE):
        block_k = max(_LANE, _round_up(block_k // 2, _LANE))
        w1_bufs = 2
    # TODO(synk): for very large H (block_m*Hp*4 alone exceeds the budget) add an
    # H grid axis (tile Hp, accumulate fc2 partials into an f32 output scratch)
    # instead of shrinking block_m further.

    # Feed both v7x TensorCores: give the "parallel" batch axis >= 2 tiles.
    if Bp8 >= 2 * _SUB and block_m >= Bp8:
        block_m = _round_up((Bp8 + 1) // 2, _SUB)

    return block_m, block_k


def _maybe_pad2(a, rows, cols, dtype):
    """Cast + zero-pad a 2-D array only when actually needed (no extra HBM pass)."""
    if a.dtype != dtype:
        a = a.astype(dtype)
    pr, pc = rows - a.shape[0], cols - a.shape[1]
    if pr or pc:
        a = jnp.pad(a, ((0, pr), (0, pc)))
    return a


def classifier_forward(x, w1, b1, w2, b2, *, compute_dtype=jnp.bfloat16,
                       block_m=None, block_k=None):
    """x: (B, D). w1: (D, H=D//2), b1: (H,), w2: (H, C), b2: (C,).

    Weights are stored pre-transposed as (in_features, out_features).
    Returns sigmoid(relu(x @ w1 + b1) @ w2 + b2).squeeze().
    Matmul operands run in `compute_dtype` (bf16 default); accumulation and the
    bias/relu/sigmoid epilogue stay f32.
    """
    B, D = x.shape
    H = w1.shape[1]
    C = w2.shape[1]
    cdt = jnp.dtype(compute_dtype if compute_dtype is not None else x.dtype)
    itemsize = cdt.itemsize

    # Pad lane dims to 128 and the batch to 8 so every store is lane-dense and
    # the MXU sees full tiles; zero padding does not change the math.
    Dp = _round_up(D, _LANE)
    Hp = _round_up(H, _LANE)
    Cp = _round_up(C, _LANE)

    sel_m, sel_k = _select_tiles(B, Dp, Hp, Cp, itemsize)
    block_m = sel_m if block_m is None else _round_up(block_m, _SUB)
    block_k = sel_k if block_k is None else _round_up(block_k, _LANE)

    Bp = _round_up(_round_up(B, _SUB), block_m)
    Dp = _round_up(Dp, block_k)
    num_m, num_k = Bp // block_m, Dp // block_k
    w1_resident = (num_k == 1)

    xp = _maybe_pad2(x, Bp, Dp, cdt)
    w1p = _maybe_pad2(w1, Dp, Hp, cdt)
    w2p = _maybe_pad2(w2, Hp, Cp, cdt)
    b1p = _maybe_pad2(b1.reshape(1, -1), 1, Hp, jnp.float32)
    b2p = _maybe_pad2(b2.reshape(1, -1), 1, Cp, jnp.float32)

    footprint = _vmem_footprint(block_m, block_k, Hp, Cp, itemsize,
                                1 if w1_resident else 2)
    vmem_limit = int(min(_VMEM_LIMIT_CAP,
                         max(32 << 20, footprint + (footprint >> 2) + (1 << 20))))

    cost = pl.CostEstimate(
        flops=2 * Bp * Dp * Hp + 2 * Bp * Hp * Cp,
        transcendentals=Bp * Cp,
        bytes_accessed=(Bp * Dp * itemsize                               # x
                        + (1 if w1_resident else num_m) * Dp * Hp * itemsize  # w1 (re)reads
                        + Hp * Cp * itemsize + 4 * (Hp + Cp)             # w2 + biases
                        + 4 * Bp * Cp),                                  # output
    )

    def run(single_buffer):
        # Constant-index (resident) operands get a single VMEM buffer.
        res_kw = {"pipeline_mode": pl.Buffered(1)} if single_buffer else {}
        if w1_resident:
            w1_spec = pl.BlockSpec((block_k, Hp), lambda i, k: (0, 0), **res_kw)
        else:
            w1_spec = pl.BlockSpec((block_k, Hp), lambda i, k: (k, 0))
        out = pl.pallas_call(
            _classifier_kernel,
            out_shape=jax.ShapeDtypeStruct((Bp, Cp), jnp.float32),
            grid=(num_m, num_k),                                   # K axis last
            in_specs=[
                pl.BlockSpec((block_m, block_k), lambda i, k: (i, k)),   # x slab
                w1_spec,                                                 # w1
                pl.BlockSpec((1, Hp), lambda i, k: (0, 0), **res_kw),    # b1
                pl.BlockSpec((Hp, Cp), lambda i, k: (0, 0), **res_kw),   # w2
                pl.BlockSpec((1, Cp), lambda i, k: (0, 0), **res_kw),    # b2
            ],
            out_specs=pl.BlockSpec((block_m, Cp), lambda i, k: (i, 0)),  # lane-dense
            scratch_shapes=[pltpu.VMEM((block_m, Hp), jnp.float32)],     # fc1 acc
            compiler_params=pltpu.CompilerParams(
                dimension_semantics=("parallel", "arbitrary"),
                vmem_limit_bytes=vmem_limit),
            cost_estimate=cost,
        )(xp, w1p, b1p, w2p, b2p)
        return jax.block_until_ready(out)

    try:
        out = run(single_buffer=True)
    except Exception:
        # Fallback for jax versions without BlockSpec(pipeline_mode=...).
        out = run(single_buffer=False)

    # Strip padding; PyTorch `.squeeze()` removes all size-1 dims (wrapper glue).
    return jnp.squeeze(out[:B, :C])


def init_params(key, input_size, out_channels):
    """Deterministic init mimicking nn.Linear's uniform(-1/sqrt(fan_in), +)."""
    hidden = input_size // 2
    k1, k2, k3, k4 = jax.random.split(key, 4)
    lim1 = 1.0 / jnp.sqrt(jnp.float32(input_size))
    lim2 = 1.0 / jnp.sqrt(jnp.float32(hidden))
    # Stored already transposed: (in_features, out_features).
    w1 = jax.random.uniform(k1, (input_size, hidden), jnp.float32, -lim1, lim1)
    b1 = jax.random.uniform(k2, (hidden,), jnp.float32, -lim1, lim1)
    w2 = jax.random.uniform(k3, (hidden, out_channels), jnp.float32, -lim2, lim2)
    b2 = jax.random.uniform(k4, (out_channels,), jnp.float32, -lim2, lim2)
    return w1, b1, w2, b2


if __name__ == "__main__":
    key = jax.random.PRNGKey(0)
    batch, input_size, out_channels = 2, 32, 4

    kx, kp = jax.random.split(key)
    x = jax.random.normal(kx, (batch, input_size), jnp.float32)
    w1, b1, w2, b2 = init_params(kp, input_size, out_channels)

    # Pure-JAX reference (same math as the PyTorch forward).
    ref = jnp.squeeze(jax.nn.sigmoid(jnp.maximum(x @ w1 + b1, 0.0) @ w2 + b2))

    # Exact-precision path (f32 operands): must match the reference to 1e-5.
    out_f32 = classifier_forward(x, w1, b1, w2, b2, compute_dtype=jnp.float32)
    out_f32 = jax.block_until_ready(out_f32)
    assert out_f32.shape == ref.shape
    assert jnp.allclose(out_f32, ref, atol=1e-5, rtol=1e-5)

    # Default fast path (bf16 matmul operands, f32 accumulation + epilogue).
    out_bf16 = jax.block_until_ready(classifier_forward(x, w1, b1, w2, b2))
    assert out_bf16.shape == ref.shape
    assert jnp.allclose(out_bf16, ref, atol=5e-2, rtol=5e-2)

    print("KERNEL_OK")
</pallas_src>

<mosaic_0001>
module attributes {stable_mosaic.version = 11 : i64} {
  func.func @_classifier_kernel(%arg0: i32, %arg1: i32, %arg2: memref<8x128xf32, #tpu.memory_space<vmem>>, %arg3: memref<128x128xf32, #tpu.memory_space<vmem>>, %arg4: memref<1x128xf32, #tpu.memory_space<vmem>>, %arg5: memref<128x128xf32, #tpu.memory_space<vmem>>, %arg6: memref<1x128xf32, #tpu.memory_space<vmem>>, %arg7: memref<8x128xf32, #tpu.memory_space<vmem>>, %arg8: memref<8x128xf32, #tpu.memory_space<vmem>>) attributes {dimension_semantics = [#tpu.dimension_semantics<parallel>, #tpu.dimension_semantics<arbitrary>], iteration_bounds = array<i64: 1, 1>, scalar_prefetch = 0 : i64, scratch_operands = 1 : i64, tpu.core_type = #tpu.core_type<tc>, window_params = [{transform_indices = @transform_0, window_bounds = array<i64: 8, 128>}, {pipeline_mode = #tpu.pipeline_mode<synchronous>, transform_indices = @transform_1, window_bounds = array<i64: 128, 128>}, {pipeline_mode = #tpu.pipeline_mode<synchronous>, transform_indices = @transform_2, window_bounds = array<i64: 1, 128>}, {pipeline_mode = #tpu.pipeline_mode<synchronous>, transform_indices = @transform_3, window_bounds = array<i64: 128, 128>}, {pipeline_mode = #tpu.pipeline_mode<synchronous>, transform_indices = @transform_4, window_bounds = array<i64: 1, 128>}, {transform_indices = @transform_5, window_bounds = array<i64: 8, 128>}]} {
    %c0_i32 = arith.constant 0 : i32
    %0 = arith.cmpi eq, %arg1, %c0_i32 : i32
    %1 = arith.extui %0 : i1 to i32
    %c0_i32_0 = arith.constant 0 : i32
    %2 = arith.cmpi ne, %1, %c0_i32_0 : i32
    scf.if %2 {
      %c0_10 = arith.constant 0 : index
      %c0_11 = arith.constant 0 : index
      %12 = vector.load %arg4[%c0_10, %c0_11] : memref<1x128xf32, #tpu.memory_space<vmem>>, vector<1x128xf32>
      %13 = vector.shape_cast %12 : vector<1x128xf32> to vector<1x128xf32>
      %14 = vector.broadcast %13 : vector<1x128xf32> to vector<8x128xf32>
      %c0_12 = arith.constant 0 : index
      %c0_13 = arith.constant 0 : index
      %15 = vector.load %arg8[%c0_12, %c0_13] : memref<8x128xf32, #tpu.memory_space<vmem>>, vector<8x128xf32>
      tpu.vector_store %arg8[%c0_12, %c0_13], %14 {strides = array<i32>} : memref<8x128xf32, #tpu.memory_space<vmem>>, vector<8x128xf32>,
    } else {
    }
    %c0 = arith.constant 0 : index
    %c0_1 = arith.constant 0 : index
    %3 = vector.load %arg8[%c0, %c0_1] : memref<8x128xf32, #tpu.memory_space<vmem>>, vector<8x128xf32>
    %c0_2 = arith.constant 0 : index
    %c0_3 = arith.constant 0 : index
    %4 = vector.load %arg2[%c0_2, %c0_3] : memref<8x128xf32, #tpu.memory_space<vmem>>, vector<8x128xf32>
    %c0_4 = arith.constant 0 : index
    %c0_5 = arith.constant 0 : index
    %5 = vector.load %arg3[%c0_4, %c0_5] : memref<128x128xf32, #tpu.memory_space<vmem>>, vector<128x128xf32>
    %cst = arith.constant dense<0.000000e+00> : vector<8x128xf32>
    %6 = tpu.matmul %4, %5, %cst {dimension_numbers = #tpu.dot_dimension_numbers<[1], [0], [0], [1], [0, 0, 1, 1], [], []>} : vector<8x128xf32>, vector<128x128xf32>, vector<8x128xf32> -> vector<8x128xf32>
    %7 = arith.addf %3, %6 : vector<8x128xf32>
    %c0_6 = arith.constant 0 : index
    %c0_7 = arith.constant 0 : index
    %8 = vector.load %arg8[%c0_6, %c0_7] : memref<8x128xf32, #tpu.memory_space<vmem>>, vector<8x128xf32>
    tpu.vector_store %arg8[%c0_6, %c0_7], %7 {strides = array<i32>} : memref<8x128xf32, #tpu.memory_space<vmem>>, vector<8x128xf32>,
    %c0_i32_8 = arith.constant 0 : i32
    %9 = arith.cmpi eq, %arg1, %c0_i32_8 : i32
    %10 = arith.extui %9 : i1 to i32
    %c0_i32_9 = arith.constant 0 : i32
    %11 = arith.cmpi ne, %10, %c0_i32_9 : i32
    scf.if %11 {
      %c0_10 = arith.constant 0 : index
      %c0_11 = arith.constant 0 : index
      %12 = vector.load %arg8[%c0_10, %c0_11] : memref<8x128xf32, #tpu.memory_space<vmem>>, vector<8x128xf32>
      %cst_12 = arith.constant 0.000000e+00 : f32
      %13 = vector.broadcast %cst_12 : f32 to vector<8x128xf32>
      %14 = arith.maximumf %12, %13 : vector<8x128xf32>
      %c0_13 = arith.constant 0 : index
      %c0_14 = arith.constant 0 : index
      %15 = vector.load %arg5[%c0_13, %c0_14] : memref<128x128xf32, #tpu.memory_space<vmem>>, vector<128x128xf32>
      %cst_15 = arith.constant dense<0.000000e+00> : vector<8x128xf32>
      %16 = tpu.matmul %14, %15, %cst_15 {dimension_numbers = #tpu.dot_dimension_numbers<[1], [0], [0], [1], [0, 0, 1, 1], [], []>} : vector<8x128xf32>, vector<128x128xf32>, vector<8x128xf32> -> vector<8x128xf32>
      %c0_16 = arith.constant 0 : index
      %c0_17 = arith.constant 0 : index
      %17 = vector.load %arg6[%c0_16, %c0_17] : memref<1x128xf32, #tpu.memory_space<vmem>>, vector<1x128xf32>
      %18 = vector.broadcast %17 : vector<1x128xf32> to vector<8x128xf32>
      %19 = arith.addf %16, %18 : vector<8x128xf32>
      %20 = arith.negf %19 : vector<8x128xf32>
      %21 = math.exp %20 : vector<8x128xf32>
      %cst_18 = arith.constant 1.000000e+00 : f32
      %22 = vector.broadcast %cst_18 : f32 to vector<8x128xf32>
      %23 = arith.addf %22, %21 : vector<8x128xf32>
      %24 = arith.divf %22, %23 : vector<8x128xf32>
      %c0_19 = arith.constant 0 : index
      %c0_20 = arith.constant 0 : index
      %25 = vector.load %arg7[%c0_19, %c0_20] : memref<8x128xf32, #tpu.memory_space<vmem>>, vector<8x128xf32>
      tpu.vector_store %arg7[%c0_19, %c0_20], %24 {strides = array<i32>} : memref<8x128xf32, #tpu.memory_space<vmem>>, vector<8x128xf32>,
    } else {
    }
    return
  }
  func.func @transform_0(%arg0: i32, %arg1: i32) -> (i32, i32) {
    %c0_i32 = arith.constant 0 : i32
    return %arg0, %arg1 : i32, i32
  }
  func.func @transform_1(%arg0: i32, %arg1: i32) -> (i32, i32) {
    %c0_i32 = arith.constant 0 : i32
    %c0_i32_0 = arith.constant 0 : i32
    %c0_i32_1 = arith.constant 0 : i32
    return %c0_i32, %c0_i32_0 : i32, i32
  }
  func.func @transform_2(%arg0: i32, %arg1: i32) -> (i32, i32) {
    %c0_i32 = arith.constant 0 : i32
    %c0_i32_0 = arith.constant 0 : i32
    %c0_i32_1 = arith.constant 0 : i32
    return %c0_i32, %c0_i32_0 : i32, i32
  }
  func.func @transform_3(%arg0: i32, %arg1: i32) -> (i32, i32) {
    %c0_i32 = arith.constant 0 : i32
    %c0_i32_0 = arith.constant 0 : i32
    %c0_i32_1 = arith.constant 0 : i32
    return %c0_i32, %c0_i32_0 : i32, i32
  }
  func.func @transform_4(%arg0: i32, %arg1: i32) -> (i32, i32) {
    %c0_i32 = arith.constant 0 : i32
    %c0_i32_0 = arith.constant 0 : i32
    %c0_i32_1 = arith.constant 0 : i32
    return %c0_i32, %c0_i32_0 : i32, i32
  }
  func.func @transform_5(%arg0: i32, %arg1: i32) -> (i32, i32) {
    %c0_i32 = arith.constant 0 : i32
    %c0_i32_0 = arith.constant 0 : i32
    return %arg0, %c0_i32 : i32, i32
  }
}

module attributes {stable_mosaic.version = 11 : i64} {
  func.func @_classifier_kernel(%arg0: i32, %arg1: i32, %arg2: memref<8x128xf32, #tpu.memory_space<vmem>>, %arg3: memref<128x128xf32, #tpu.memory_space<vmem>>, %arg4: memref<1x128xf32, #tpu.memory_space<vmem>>, %arg5: memref<128x128xf32, #tpu.memory_space<vmem>>, %arg6: memref<1x128xf32, #tpu.memory_space<vmem>>, %arg7: memref<8x128xf32, #tpu.memory_space<vmem>>, %arg8: memref<8x128xf32, #tpu.memory_space<vmem>>) attributes {dimension_semantics = [#tpu.dimension_semantics<parallel>, #tpu.dimension_semantics<arbitrary>], iteration_bounds = array<i64: 1, 1>, scalar_prefetch = 0 : i64, scratch_operands = 1 : i64, tpu.core_type = #tpu.core_type<tc>, window_params = [{transform_indices = @transform_0, window_bounds = array<i64: 8, 128>}, {pipeline_mode = #tpu.pipeline_mode<synchronous>, transform_indices = @transform_1, window_bounds = array<i64: 128, 128>}, {pipeline_mode = #tpu.pipeline_mode<synchronous>, transform_indices = @transform_2, window_bounds = array<i64: 1, 128>}, {pipeline_mode = #tpu.pipeline_mode<synchronous>, transform_indices = @transform_3, window_bounds = array<i64: 128, 128>}, {pipeline_mode = #tpu.pipeline_mode<synchronous>, transform_indices = @transform_4, window_bounds = array<i64: 1, 128>}, {transform_indices = @transform_5, window_bounds = array<i64: 8, 128>}]} {
    %c0_i32 = arith.constant 0 : i32
    %0 = arith.cmpi eq, %arg1, %c0_i32 : i32
    %1 = arith.extui %0 : i1 to i32
    %c0_i32_0 = arith.constant 0 : i32
    %2 = arith.cmpi ne, %1, %c0_i32_0 : i32
    scf.if %2 {
      %c0_10 = arith.constant 0 : index
      %c0_11 = arith.constant 0 : index
      %12 = vector.load %arg4[%c0_10, %c0_11] : memref<1x128xf32, #tpu.memory_space<vmem>>, vector<1x128xf32>
      %13 = vector.shape_cast %12 : vector<1x128xf32> to vector<1x128xf32>
      %14 = vector.broadcast %13 : vector<1x128xf32> to vector<8x128xf32>
      %c0_12 = arith.constant 0 : index
      %c0_13 = arith.constant 0 : index
      %15 = vector.load %arg8[%c0_12, %c0_13] : memref<8x128xf32, #tpu.memory_space<vmem>>, vector<8x128xf32>
      tpu.vector_store %arg8[%c0_12, %c0_13], %14 {strides = array<i32>} : memref<8x128xf32, #tpu.memory_space<vmem>>, vector<8x128xf32>,
    } else {
    }
    %c0 = arith.constant 0 : index
    %c0_1 = arith.constant 0 : index
    %3 = vector.load %arg8[%c0, %c0_1] : memref<8x128xf32, #tpu.memory_space<vmem>>, vector<8x128xf32>
    %c0_2 = arith.constant 0 : index
    %c0_3 = arith.constant 0 : index
    %4 = vector.load %arg2[%c0_2, %c0_3] : memref<8x128xf32, #tpu.memory_space<vmem>>, vector<8x128xf32>
    %c0_4 = arith.constant 0 : index
    %c0_5 = arith.constant 0 : index
    %5 = vector.load %arg3[%c0_4, %c0_5] : memref<128x128xf32, #tpu.memory_space<vmem>>, vector<128x128xf32>
    %cst = arith.constant dense<0.000000e+00> : vector<8x128xf32>
    %6 = tpu.matmul %4, %5, %cst {dimension_numbers = #tpu.dot_dimension_numbers<[1], [0], [0], [1], [0, 0, 1, 1], [], []>} : vector<8x128xf32>, vector<128x128xf32>, vector<8x128xf32> -> vector<8x128xf32>
    %7 = arith.addf %3, %6 : vector<8x128xf32>
    %c0_6 = arith.constant 0 : index
    %c0_7 = arith.constant 0 : index
    %8 = vector.load %arg8[%c0_6, %c0_7] : memref<8x128xf32, #tpu.memory_space<vmem>>, vector<8x128xf32>
    tpu.vector_store %arg8[%c0_6, %c0_7], %7 {strides = array<i32>} : memref<8x128xf32, #tpu.memory_space<vmem>>, vector<8x128xf32>,
    %c0_i32_8 = arith.constant 0 : i32
    %9 = arith.cmpi eq, %arg1, %c0_i32_8 : i32
    %10 = arith.extui %9 : i1 to i32
    %c0_i32_9 = arith.constant 0 : i32
    %11 = arith.cmpi ne, %10, %c0_i32_9 : i32
    scf.if %11 {
      %c0_10 = arith.constant 0 : index
      %c0_11 = arith.constant 0 : index
      %12 = vector.load %arg8[%c0_10, %c0_11] : memref<8x128xf32, #tpu.memory_space<vmem>>, vector<8x128xf32>
      %cst_12 = arith.constant 0.000000e+00 : f32
      %13 = vector.broadcast %cst_12 : f32 to vector<8x128xf32>
      %14 = arith.maximumf %12, %13 : vector<8x128xf32>
      %c0_13 = arith.constant 0 : index
      %c0_14 = arith.constant 0 : index
      %15 = vector.load %arg5[%c0_13, %c0_14] : memref<128x128xf32, #tpu.memory_space<vmem>>, vector<128x128xf32>
      %cst_15 = arith.constant dense<0.000000e+00> : vector<8x128xf32>
      %16 = tpu.matmul %14, %15, %cst_15 {dimension_numbers = #tpu.dot_dimension_numbers<[1], [0], [0], [1], [0, 0, 1, 1], [], []>} : vector<8x128xf32>, vector<128x128xf32>, vector<8x128xf32> -> vector<8x128xf32>
      %c0_16 = arith.constant 0 : index
      %c0_17 = arith.constant 0 : index
      %17 = vector.load %arg6[%c0_16, %c0_17] : memref<1x128xf32, #tpu.memory_space<vmem>>, vector<1x128xf32>
      %18 = vector.broadcast %17 : vector<1x128xf32> to vector<8x128xf32>
      %19 = arith.addf %16, %18 : vector<8x128xf32>
      %20 = arith.negf %19 : vector<8x128xf32>
      %21 = math.exp %20 : vector<8x128xf32>
      %cst_18 = arith.constant 1.000000e+00 : f32
      %22 = vector.broadcast %cst_18 : f32 to vector<8x128xf32>
      %23 = arith.addf %22, %21 : vector<8x128xf32>
      %24 = arith.divf %22, %23 : vector<8x128xf32>
      %c0_19 = arith.constant 0 : index
      %c0_20 = arith.constant 0 : index
      %25 = vector.load %arg7[%c0_19, %c0_20] : memref<8x128xf32, #tpu.memory_space<vmem>>, vector<8x128xf32>
      tpu.vector_store %arg7[%c0_19, %c0_20], %24 {strides = array<i32>} : memref<8x128xf32, #tpu.memory_space<vmem>>, vector<8x128xf32>,
    } else {
    }
    return
  }
  func.func @transform_0(%arg0: i32, %arg1: i32) -> (i32, i32) {
    %c0_i32 = arith.constant 0 : i32
    return %arg0, %arg1 : i32, i32
  }
  func.func @transform_1(%arg0: i32, %arg1: i32) -> (i32, i32) {
    %c0_i32 = arith.constant 0 : i32
    %c0_i32_0 = arith.constant 0 : i32
    %c0_i32_1 = arith.constant 0 : i32
    return %c0_i32, %c0_i32_0 : i32, i32
  }
  func.func @transform_2(%arg0: i32, %arg1: i32) -> (i32, i32) {
    %c0_i32 = arith.constant 0 : i32
    %c0_i32_0 = arith.constant 0 : i32
    %c0_i32_1 = arith.constant 0 : i32
    return %c0_i32, %c0_i32_0 : i32, i32
  }
  func.func @transform_3(%arg0: i32, %arg1: i32) -> (i32, i32) {
    %c0_i32 = arith.constant 0 : i32
    %c0_i32_0 = arith.constant 0 : i32
    %c0_i32_1 = arith.constant 0 : i32
    return %c0_i32, %c0_i32_0 : i32, i32
  }
  func.func @transform_4(%arg0: i32, %arg1: i32) -> (i32, i32) {
    %c0_i32 = arith.constant 0 : i32
    %c0_i32_0 = arith.constant 0 : i32
    %c0_i32_1 = arith.constant 0 : i32
    return %c0_i32, %c0_i32_0 : i32, i32
  }
  func.func @transform_5(%arg0: i32, %arg1: i32) -> (i32, i32) {
    %c0_i32 = arith.constant 0 : i32
    %c0_i32_0 = arith.constant 0 : i32
    return %arg0, %c0_i32 : i32, i32
  }
}

</mosaic_0001>

<bundles_post_ra>
// kernel: tpu_custom_call.1
= control target key start
LH: loop header
LB: loop body
LE: loop exit
PB: predicated region body
PF: predicated region fallthrough
CT: control target
= control target key end

     0   :  { %10 = vsyncpa [#allocation4], 0  ;;  %s578_s0 = inlined_call_operand.hbm [shape: f32[8,128], index: 0, kind: input, shape index: {}]   ;;  %s579_s1 = inlined_call_operand.hbm [shape: f32[128,128], index: 1, kind: input, shape index: {}]   ;;  %s580_s2 = inlined_call_operand.vmem [shape: f32[1,128], index: 2, kind: input, shape index: {}]   ;;  %s581_s3 = inlined_call_operand.hbm [shape: f32[128,128], index: 3, kind: input, shape index: {}]   ;;  %s582_s4 = inlined_call_operand.vmem [shape: f32[1,128], index: 4, kind: input, shape index: {}]   ;;  %s583_s5 = inlined_call_operand.hbm [shape: f32[8,128], index: 5, kind: output, shape index: {}]  }
   0x1   :  { %11 = vsyncpa [#allocation7], 0 }
   0x2   :  { %12 = vsyncpa [#allocation5], 0  ;;  %s488_s18 = smov [#allocation6]  }
   0x3   :  { %s28_s19 = sshll.u32 %s488_s18, 4  ;;  %s29_s19 = int_to_ptr.vmem [resolvable:$true] %s28_s19 }
   0x4   :  { %s410_s20 = scalar_lea.vmem %s29_s19, 2048  ;;  %p415_p1 = scmp.lt.s32.totalorder %s29_s19, %s29_s19 }
   0x5   :  { %p411_p0 = scmp.ne.s32.totalorder %s29_s19, %s410_s20  ;;  %p416_p2 = scmp.lt.s32.totalorder %s410_s20, %s410_s20 }
   0x7   :  { %p417_p3 = por %p416_p2, %p415_p1 }
   0x9   :  { %p418_p4 = pnand %p417_p3, %p411_p0 }
   0xb   :  { %421 = shalt.err (!%p418_p4)
}
   0xc   :  { %s489_s21 = smov 128   ;;  %s490_s22 = smov 8  }
   0xd   :  { %34 = dma.hbm_to_vmem [thread:$0]  %s579_s1, 2048, %s29_s19, [#allocation7], %s489_s21, %s489_s21, %s490_s22  }
   0xe   :  { %s491_s25 = smov [#allocation3]   ;;  %s492_s27 = smov [#allocation8]  }
   0xf   :  { %s19_s26 = sshll.u32 %s491_s25, 4  ;;  %s42_s28 = sshll.u32 %s492_s27, 4  ;;  %s20_s26 = int_to_ptr.vmem [resolvable:$true] %s19_s26  ;;  %s43_s28 = int_to_ptr.vmem [resolvable:$true] %s42_s28 }
  0x10   :  { %s430_s29 = scalar_lea.vmem %s20_s26, 128  ;;  %p435_p6 = scmp.lt.s32.totalorder %s20_s26, %s20_s26 }
  0x11   :  { %p431_p5 = scmp.ne.s32.totalorder %s20_s26, %s430_s29  ;;  %p436_p7 = scmp.lt.s32.totalorder %s430_s29, %s430_s29 }
  0x13   :  { %p437_p8 = por %p436_p7, %p435_p6 }
  0x15   :  { %p438_p9 = pnand %p437_p8, %p431_p5 }
  0x17   :  { %441 = shalt.err (!%p438_p9)
}
  0x18   :  { %22 = dma.hbm_to_vmem [thread:$0]  %s578_s0, 128, %s20_s26, [#allocation4]  }
  0x19   :  { %s450_s7 = scalar_lea.vmem %s43_s28, 2048  ;;  %p455_p11 = scmp.lt.s32.totalorder %s43_s28, %s43_s28 }
  0x1a   :  { %p451_p10 = scmp.ne.s32.totalorder %s43_s28, %s450_s7  ;;  %p456_p12 = scmp.lt.s32.totalorder %s450_s7, %s450_s7 }
  0x1c   :  { %p457_p13 = por %p456_p12, %p455_p11 }
  0x1e   :  { %p458_p0 = pnand %p457_p13, %p451_p10 }
  0x20   :  { %461 = shalt.err (!%p458_p0)
}
  0x21   :  { %48 = dma.hbm_to_vmem [thread:$0]  %s581_s3, 2048, %s43_s28, [#allocation7], %s489_s21, %s489_s21, %s490_s22  }
  0x22   :  { %482 = dma.done.wait [#allocation4], 128  }
  0x23   :  { %483 = vsyncadd [#allocation4], 4294967168 }
  0x24   :  { %484 = dma.done.wait [#allocation7], 4096  }
  0x25   :  { %485 = vsyncadd [#allocation7], 4294963200  ;;  %v493_v0 = vmov 0.0   ;;  %vm494_vm0 = vmmov 0   ;;  %v89_v1 = vld [vmem:[#allocation6 + $0x78] sm:$0xff]  ;;  %v88_v2 = vld [vmem:[#allocation6 + $0x70] sm:$0xff] }
  0x26   :  { %320 = vmatprep.subr.mxu0 %v493_v0  ;;  %352 = vmatprep.mubr.msk.f32.mxu0 %vm494_vm0, %v493_v0  ;;  %v87_v3 = vld [vmem:[#allocation6 + $0x68] sm:$0xff]  ;;  %v86_v4 = vld [vmem:[#allocation6 + $0x60] sm:$0xff]  ;;  %v182_v5 = vld [vmem:[#allocation8 + $0x78] sm:$0xff]  ;;  %s495_s11 = smov [#allocation9]  }
  0x27   :  { %355 = vmatprep.subr.mxu1 %v493_v0  ;;  %387 = vmatprep.mubr.msk.f32.mxu1 %vm494_vm0, %v493_v0  ;;  %v85_v6 = vld [vmem:[#allocation6 + $0x58] sm:$0xff]  ;;  %v181_v7 = vld [vmem:[#allocation8 + $0x70] sm:$0xff]  ;;  %v180_v8 = vld [vmem:[#allocation8 + $0x68] sm:$0xff]  ;;  %s273_s12 = sshll.u32 %s495_s11, 4  ;;  %s274_s12 = int_to_ptr.vmem [resolvable:$true] %s273_s12 }
  0x28   :  { %321 = vmatpush3.msra.mxu0 %v89_v1  ;;  %356 = vmatpush3.msra.mxu1 %v182_v5  ;;  %v84_v9 = vld [vmem:[#allocation6 + $0x50] sm:$0xff]  ;;  %v179_v10 = vld [vmem:[#allocation8 + $0x60] sm:$0xff]  ;;  %v83_v11 = vld [vmem:[#allocation6 + $0x48] sm:$0xff]  ;;  %p467_p2 = scmp.lt.s32.totalorder %s274_s12, %s274_s12 }
  0x29   :  { %322 = vmatprep.subr.mxu0 %v493_v0  ;;  %357 = vmatprep.subr.mxu1 %v493_v0  ;;  %v178_v12 = vld [vmem:[#allocation8 + $0x58] sm:$0xff]  ;;  %v82_v13 = vld [vmem:[#allocation6 + $0x40] sm:$0xff]  ;;  %v177_v14 = vld [vmem:[#allocation8 + $0x50] sm:$0xff] }
  0x2a   :  { %323 = vmatpush3.msra.mxu0 %v88_v2  ;;  %358 = vmatpush3.msra.mxu1 %v181_v7  ;;  %v81_v15 = vld [vmem:[#allocation6 + $0x38] sm:$0xff]  ;;  %v176_v16 = vld [vmem:[#allocation8 + $0x48] sm:$0xff]  ;;  %v80_v17 = vld [vmem:[#allocation6 + $0x30] sm:$0xff] }
  0x2b   :  { %324 = vmatprep.subr.mxu0 %v493_v0  ;;  %359 = vmatprep.subr.mxu1 %v493_v0  ;;  %v175_v18 = vld [vmem:[#allocation8 + $0x40] sm:$0xff]  ;;  %v79_v19 = vld [vmem:[#allocation6 + $0x28] sm:$0xff]  ;;  %v174_v20 = vld [vmem:[#allocation8 + $0x38] sm:$0xff] }
  0x2c   :  { %325 = vmatpush3.msra.mxu0 %v87_v3  ;;  %360 = vmatpush3.msra.mxu1 %v180_v8  ;;  %v78_v21 = vld [vmem:[#allocation6 + $0x20] sm:$0xff]  ;;  %v173_v22 = vld [vmem:[#allocation8 + $0x30] sm:$0xff]  ;;  %v77_v23 = vld [vmem:[#allocation6 + $0x18] sm:$0xff] }
  0x2d   :  { %326 = vmatprep.subr.mxu0 %v493_v0  ;;  %361 = vmatprep.subr.mxu1 %v493_v0  ;;  %v172_v24 = vld [vmem:[#allocation8 + $0x28] sm:$0xff]  ;;  %v76_v25 = vld [vmem:[#allocation6 + $0x10] sm:$0xff]  ;;  %v171_v26 = vld [vmem:[#allocation8 + $0x20] sm:$0xff] }
  0x2e   :  { %327 = vmatpush3.msra.mxu0 %v86_v4  ;;  %362 = vmatpush3.msra.mxu1 %v179_v10  ;;  %v75_v27 = vld [vmem:[#allocation6 + $0x8] sm:$0xff]  ;;  %v170_v28 = vld [vmem:[#allocation8 + $0x18] sm:$0xff]  ;;  %v74_v29 = vld [vmem:[#allocation6] sm:$0xff] }
  0x2f   :  { %328 = vmatprep.subr.mxu0 %v493_v0  ;;  %363 = vmatprep.subr.mxu1 %v493_v0  ;;  %v73_v30 = vld [vmem:[#allocation3] sm:$0xff]  ;;  %v169_v31 = vld [vmem:[#allocation8 + $0x10] sm:$0xff]  ;;  %v168_v32 = vld [vmem:[#allocation8 + $0x8] sm:$0xff] }
  0x30   :  { %329 = vmatpush3.msra.mxu0 %v85_v6  ;;  %364 = vmatpush3.msra.mxu1 %v178_v12  ;;  %v167_v33 = vld [vmem:[#allocation8] sm:$0xff]  ;;  %v283_v34 = vld [vmem:[%s580_s2] ss:$0 sm:$0xff]  ;;  %s462_s2 = scalar_lea.vmem %s274_s12, 128 }
  0x31   :  { %330 = vmatprep.subr.mxu0 %v493_v0  ;;  %365 = vmatprep.subr.mxu1 %v493_v0  ;;  %v284_v39 = vld [vmem:[%s582_s4] ss:$0 sm:$0xff]  ;;  %p463_p1 = scmp.ne.s32.totalorder %s274_s12, %s462_s2  ;;  %p468_p3 = scmp.lt.s32.totalorder %s462_s2, %s462_s2 }
  0x32   :  { %331 = vmatpush3.msra.mxu0 %v84_v9  ;;  %366 = vmatpush3.msra.mxu1 %v177_v14 }
  0x33   :  { %332 = vmatprep.subr.mxu0 %v493_v0  ;;  %367 = vmatprep.subr.mxu1 %v493_v0  ;;  %p469_p4 = por %p468_p3, %p467_p2 }
  0x34   :  { %333 = vmatpush3.msra.mxu0 %v83_v11  ;;  %368 = vmatpush3.msra.mxu1 %v176_v16 }
  0x35   :  { %334 = vmatprep.subr.mxu0 %v493_v0  ;;  %369 = vmatprep.subr.mxu1 %v493_v0  ;;  %p470_p5 = pnand %p469_p4, %p463_p1 }
  0x36   :  { %335 = vmatpush3.msra.mxu0 %v82_v13  ;;  %370 = vmatpush3.msra.mxu1 %v175_v18 }
  0x37   :  { %336 = vmatprep.subr.mxu0 %v493_v0  ;;  %371 = vmatprep.subr.mxu1 %v493_v0 }
  0x38   :  { %337 = vmatpush3.msra.mxu0 %v81_v15  ;;  %372 = vmatpush3.msra.mxu1 %v174_v20 }
  0x39   :  { %338 = vmatprep.subr.mxu0 %v493_v0  ;;  %373 = vmatprep.subr.mxu1 %v493_v0 }
  0x3a   :  { %339 = vmatpush3.msra.mxu0 %v80_v17  ;;  %374 = vmatpush3.msra.mxu1 %v173_v22 }
  0x3b   :  { %340 = vmatprep.subr.mxu0 %v493_v0  ;;  %375 = vmatprep.subr.mxu1 %v493_v0 }
  0x3c   :  { %341 = vmatpush3.msra.mxu0 %v79_v19  ;;  %376 = vmatpush3.msra.mxu1 %v172_v24 }
  0x3d   :  { %342 = vmatprep.subr.mxu0 %v493_v0  ;;  %377 = vmatprep.subr.mxu1 %v493_v0 }
  0x3e   :  { %343 = vmatpush3.msra.mxu0 %v78_v21  ;;  %378 = vmatpush3.msra.mxu1 %v171_v26 }
  0x3f   :  { %344 = vmatprep.subr.mxu0 %v493_v0  ;;  %379 = vmatprep.subr.mxu1 %v493_v0 }
  0x40   :  { %345 = vmatpush3.msra.mxu0 %v77_v23  ;;  %380 = vmatpush3.msra.mxu1 %v170_v28 }
  0x41   :  { %346 = vmatprep.subr.mxu0 %v493_v0  ;;  %381 = vmatprep.subr.mxu1 %v493_v0 }
  0x42   :  { %347 = vmatpush3.msra.mxu0 %v76_v25  ;;  %382 = vmatpush3.msra.mxu1 %v169_v31 }
  0x43   :  { %348 = vmatprep.subr.mxu0 %v493_v0  ;;  %383 = vmatprep.subr.mxu1 %v493_v0 }
  0x44   :  { %349 = vmatpush3.msra.mxu0 %v75_v27  ;;  %384 = vmatpush3.msra.mxu1 %v168_v32 }
  0x45   :  { %350 = vmatprep.subr.mxu0 %v493_v0  ;;  %385 = vmatprep.subr.mxu1 %v493_v0 }
  0x46   :  { %351 = vmatpush3.msra.mxu0 %v74_v29  ;;  %386 = vmatpush3.msra.mxu1 %v167_v33 }
  0x47   :  { %353 = vmatmul.mubr.f32.vlgmr.msra.gmra.mxu0 %v73_v30 }
 0x107   :  { %v156_v35 = vpop.f32.mrf.mxu0 }
 0x108   :  { %v160_v36 = vadd.f32 %v283_v34, %v156_v35 }
 0x109   :  { %v354_v37 = vpop.f32.mrf.mxu0 }
 0x10a   :  { %v166_v38 = vmax.f32 %v160_v36, 0.0 }
 0x10c   :  { %388 = vmatmul.mubr.f32.vlgmr.msra.gmra.mxu1 %v166_v38 }
 0x1cc   :  { %v256_v40 = vpop.f32.mrf.mxu1 }
 0x1cd   :  { %v257_v41 = vadd.f32 %v284_v39, %v256_v40 }
 0x1ce   :  { %v389_v42 = vpop.f32.mrf.mxu1 }
 0x1cf   :  { %v285_v43 = vmul.f32 -1.442695, %v257_v41 }
 0x1d1   :  { %398 = vpow2.f32 %v285_v43 }
 0x1de   :  { %v399_v44 = vpop.eup %398 }
 0x1df   :  { %v263_v45 = vadd.f32 1.0, %v399_v44 }
 0x1e1   :  { %400 = vrcp.f32 %v263_v45 }
 0x1ee   :  { %v401_v46 = vpop.eup %400 }
 0x1ef   :  { %266 = vst [vmem:[#allocation9] sm:$0xff] %v401_v46 }
 0x1f0   :  { %473 = shalt.err (!%p470_p5)
}
 0x1f1   :  { %276 = dma.vmem_to_hbm [thread:$0]  %s274_s12, 128, %s583_s5, [#allocation5]  }
 0x1f2   :  { %486 = dma.done.wait [#allocation5], 128  }
 0x1f3   :  { %487 = vsyncadd [#allocation5], 4294967168 }
 0x1f4   :  { %280 = vsyncpa [#allocation4], 1 }
 0x1f5   :  { %281 = vsyncpa [#allocation7], 1 }
 0x1f6   :  { %282 = vsyncpa [#allocation5], 1 }

// kernel: tpu_custom_call.1
= control target key start
LH: loop header
LB: loop body
LE: loop exit
PB: predicated region body
PF: predicated region fallthrough
CT: control target
= control target key end

     0   :  { %10 = vsyncpa [#allocation4], 0  ;;  %s578_s0 = inlined_call_operand.hbm [shape: f32[8,128], index: 0, kind: input, shape index: {}]   ;;  %s579_s1 = inlined_call_operand.hbm [shape: f32[128,128], index: 1, kind: input, shape index: {}]   ;;  %s580_s2 = inlined_call_operand.vmem [shape: f32[1,128], index: 2, kind: input, shape index: {}]   ;;  %s581_s3 = inlined_call_operand.hbm [shape: f32[128,128], index: 3, kind: input, shape index: {}]   ;;  %s582_s4 = inlined_call_operand.vmem [shape: f32[1,128], index: 4, kind: input, shape index: {}]   ;;  %s583_s5 = inlined_call_operand.hbm [shape: f32[8,128], index: 5, kind: output, shape index: {}]  }
   0x1   :  { %11 = vsyncpa [#allocation7], 0 }
   0x2   :  { %12 = vsyncpa [#allocation5], 0  ;;  %s488_s18 = smov [#allocation6]  }
   0x3   :  { %s28_s19 = sshll.u32 %s488_s18, 4  ;;  %s29_s19 = int_to_ptr.vmem [resolvable:$true] %s28_s19 }
   0x4   :  { %s410_s20 = scalar_lea.vmem %s29_s19, 2048  ;;  %p415_p1 = scmp.lt.s32.totalorder %s29_s19, %s29_s19 }
   0x5   :  { %p411_p0 = scmp.ne.s32.totalorder %s29_s19, %s410_s20  ;;  %p416_p2 = scmp.lt.s32.totalorder %s410_s20, %s410_s20 }
   0x7   :  { %p417_p3 = por %p416_p2, %p415_p1 }
   0x9   :  { %p418_p4 = pnand %p417_p3, %p411_p0 }
   0xb   :  { %421 = shalt.err (!%p418_p4)
}
   0xc   :  { %s489_s21 = smov 128   ;;  %s490_s22 = smov 8  }
   0xd   :  { %34 = dma.hbm_to_vmem [thread:$0]  %s579_s1, 2048, %s29_s19, [#allocation7], %s489_s21, %s489_s21, %s490_s22  }
   0xe   :  { %s491_s25 = smov [#allocation3]   ;;  %s492_s27 = smov [#allocation8]  }
   0xf   :  { %s19_s26 = sshll.u32 %s491_s25, 4  ;;  %s42_s28 = sshll.u32 %s492_s27, 4  ;;  %s20_s26 = int_to_ptr.vmem [resolvable:$true] %s19_s26  ;;  %s43_s28 = int_to_ptr.vmem [resolvable:$true] %s42_s28 }
  0x10   :  { %s430_s29 = scalar_lea.vmem %s20_s26, 128  ;;  %p435_p6 = scmp.lt.s32.totalorder %s20_s26, %s20_s26 }
  0x11   :  { %p431_p5 = scmp.ne.s32.totalorder %s20_s26, %s430_s29  ;;  %p436_p7 = scmp.lt.s32.totalorder %s430_s29, %s430_s29 }
  0x13   :  { %p437_p8 = por %p436_p7, %p435_p6 }
  0x15   :  { %p438_p9 = pnand %p437_p8, %p431_p5 }
  0x17   :  { %441 = shalt.err (!%p438_p9)
}
  0x18   :  { %22 = dma.hbm_to_vmem [thread:$0]  %s578_s0, 128, %s20_s26, [#allocation4]  }
  0x19   :  { %s450_s7 = scalar_lea.vmem %s43_s28, 2048  ;;  %p455_p11 = scmp.lt.s32.totalorder %s43_s28, %s43_s28 }
  0x1a   :  { %p451_p10 = scmp.ne.s32.totalorder %s43_s28, %s450_s7  ;;  %p456_p12 = scmp.lt.s32.totalorder %s450_s7, %s450_s7 }
  0x1c   :  { %p457_p13 = por %p456_p12, %p455_p11 }
  0x1e   :  { %p458_p0 = pnand %p457_p13, %p451_p10 }
  0x20   :  { %461 = shalt.err (!%p458_p0)
}
  0x21   :  { %48 = dma.hbm_to_vmem [thread:$0]  %s581_s3, 2048, %s43_s28, [#allocation7], %s489_s21, %s489_s21, %s490_s22  }
  0x22   :  { %482 = dma.done.wait [#allocation4], 128  }
  0x23   :  { %483 = vsyncadd [#allocation4], 4294967168 }
  0x24   :  { %484 = dma.done.wait [#allocation7], 4096  }
  0x25   :  { %485 = vsyncadd [#allocation7], 4294963200  ;;  %v493_v0 = vmov 0.0   ;;  %vm494_vm0 = vmmov 0   ;;  %v89_v1 = vld [vmem:[#allocation6 + $0x78] sm:$0xff]  ;;  %v88_v2 = vld [vmem:[#allocation6 + $0x70] sm:$0xff] }
  0x26   :  { %320 = vmatprep.subr.mxu0 %v493_v0  ;;  %352 = vmatprep.mubr.msk.f32.mxu0 %vm494_vm0, %v493_v0  ;;  %v87_v3 = vld [vmem:[#allocation6 + $0x68] sm:$0xff]  ;;  %v86_v4 = vld [vmem:[#allocation6 + $0x60] sm:$0xff]  ;;  %v182_v5 = vld [vmem:[#allocation8 + $0x78] sm:$0xff]  ;;  %s495_s11 = smov [#allocation9]  }
  0x27   :  { %355 = vmatprep.subr.mxu1 %v493_v0  ;;  %387 = vmatprep.mubr.msk.f32.mxu1 %vm494_vm0, %v493_v0  ;;  %v85_v6 = vld [vmem:[#allocation6 + $0x58] sm:$0xff]  ;;  %v181_v7 = vld [vmem:[#allocation8 + $0x70] sm:$0xff]  ;;  %v180_v8 = vld [vmem:[#allocation8 + $0x68] sm:$0xff]  ;;  %s273_s12 = sshll.u32 %s495_s11, 4  ;;  %s274_s12 = int_to_ptr.vmem [resolvable:$true] %s273_s12 }
  0x28   :  { %321 = vmatpush3.msra.mxu0 %v89_v1  ;;  %356 = vmatpush3.msra.mxu1 %v182_v5  ;;  %v84_v9 = vld [vmem:[#allocation6 + $0x50] sm:$0xff]  ;;  %v179_v10 = vld [vmem:[#allocation8 + $0x60] sm:$0xff]  ;;  %v83_v11 = vld [vmem:[#allocation6 + $0x48] sm:$0xff]  ;;  %p467_p2 = scmp.lt.s32.totalorder %s274_s12, %s274_s12 }
  0x29   :  { %322 = vmatprep.subr.mxu0 %v493_v0  ;;  %357 = vmatprep.subr.mxu1 %v493_v0  ;;  %v178_v12 = vld [vmem:[#allocation8 + $0x58] sm:$0xff]  ;;  %v82_v13 = vld [vmem:[#allocation6 + $0x40] sm:$0xff]  ;;  %v177_v14 = vld [vmem:[#allocation8 + $0x50] sm:$0xff] }
  0x2a   :  { %323 = vmatpush3.msra.mxu0 %v88_v2  ;;  %358 = vmatpush3.msra.mxu1 %v181_v7  ;;  %v81_v15 = vld [vmem:[#allocation6 + $0x38] sm:$0xff]  ;;  %v176_v16 = vld [vmem:[#allocation8 + $0x48] sm:$0xff]  ;;  %v80_v17 = vld [vmem:[#allocation6 + $0x30] sm:$0xff] }
  0x2b   :  { %324 = vmatprep.subr.mxu0 %v493_v0  ;;  %359 = vmatprep.subr.mxu1 %v493_v0  ;;  %v175_v18 = vld [vmem:[#allocation8 + $0x40] sm:$0xff]  ;;  %v79_v19 = vld [vmem:[#allocation6 + $0x28] sm:$0xff]  ;;  %v174_v20 = vld [vmem:[#allocation8 + $0x38] sm:$0xff] }
  0x2c   :  { %325 = vmatpush3.msra.mxu0 %v87_v3  ;;  %360 = vmatpush3.msra.mxu1 %v180_v8  ;;  %v78_v21 = vld [vmem:[#allocation6 + $0x20] sm:$0xff]  ;;  %v173_v22 = vld [vmem:[#allocation8 + $0x30] sm:$0xff]  ;;  %v77_v23 = vld [vmem:[#allocation6 + $0x18] sm:$0xff] }
  0x2d   :  { %326 = vmatprep.subr.mxu0 %v493_v0  ;;  %361 = vmatprep.subr.mxu1 %v493_v0  ;;  %v172_v24 = vld [vmem:[#allocation8 + $0x28] sm:$0xff]  ;;  %v76_v25 = vld [vmem:[#allocation6 + $0x10] sm:$0xff]  ;;  %v171_v26 = vld [vmem:[#allocation8 + $0x20] sm:$0xff] }
  0x2e   :  { %327 = vmatpush3.msra.mxu0 %v86_v4  ;;  %362 = vmatpush3.msra.mxu1 %v179_v10  ;;  %v75_v27 = vld [vmem:[#allocation6 + $0x8] sm:$0xff]  ;;  %v170_v28 = vld [vmem:[#allocation8 + $0x18] sm:$0xff]  ;;  %v74_v29 = vld [vmem:[#allocation6] sm:$0xff] }
  0x2f   :  { %328 = vmatprep.subr.mxu0 %v493_v0  ;;  %363 = vmatprep.subr.mxu1 %v493_v0  ;;  %v73_v30 = vld [vmem:[#allocation3] sm:$0xff]  ;;  %v169_v31 = vld [vmem:[#allocation8 + $0x10] sm:$0xff]  ;;  %v168_v32 = vld [vmem:[#allocation8 + $0x8] sm:$0xff] }
  0x30   :  { %329 = vmatpush3.msra.mxu0 %v85_v6  ;;  %364 = vmatpush3.msra.mxu1 %v178_v12  ;;  %v167_v33 = vld [vmem:[#allocation8] sm:$0xff]  ;;  %v283_v34 = vld [vmem:[%s580_s2] ss:$0 sm:$0xff]  ;;  %s462_s2 = scalar_lea.vmem %s274_s12, 128 }
  0x31   :  { %330 = vmatprep.subr.mxu0 %v493_v0  ;;  %365 = vmatprep.subr.mxu1 %v493_v0  ;;  %v284_v39 = vld [vmem:[%s582_s4] ss:$0 sm:$0xff]  ;;  %p463_p1 = scmp.ne.s32.totalorder %s274_s12, %s462_s2  ;;  %p468_p3 = scmp.lt.s32.totalorder %s462_s2, %s462_s2 }
  0x32   :  { %331 = vmatpush3.msra.mxu0 %v84_v9  ;;  %366 = vmatpush3.msra.mxu1 %v177_v14 }
  0x33   :  { %332 = vmatprep.subr.mxu0 %v493_v0  ;;  %367 = vmatprep.subr.mxu1 %v493_v0  ;;  %p469_p4 = por %p468_p3, %p467_p2 }
  0x34   :  { %333 = vmatpush3.msra.mxu0 %v83_v11  ;;  %368 = vmatpush3.msra.mxu1 %v176_v16 }
  0x35   :  { %334 = vmatprep.subr.mxu0 %v493_v0  ;;  %369 = vmatprep.subr.mxu1 %v493_v0  ;;  %p470_p5 = pnand %p469_p4, %p463_p1 }
  0x36   :  { %335 = vmatpush3.msra.mxu0 %v82_v13  ;;  %370 = vmatpush3.msra.mxu1 %v175_v18 }
  0x37   :  { %336 = vmatprep.subr.mxu0 %v493_v0  ;;  %371 = vmatprep.subr.mxu1 %v493_v0 }
  0x38   :  { %337 = vmatpush3.msra.mxu0 %v81_v15  ;;  %372 = vmatpush3.msra.mxu1 %v174_v20 }
  0x39   :  { %338 = vmatprep.subr.mxu0 %v493_v0  ;;  %373 = vmatprep.subr.mxu1 %v493_v0 }
  0x3a   :  { %339 = vmatpush3.msra.mxu0 %v80_v17  ;;  %374 = vmatpush3.msra.mxu1 %v173_v22 }
  0x3b   :  { %340 = vmatprep.subr.mxu0 %v493_v0  ;;  %375 = vmatprep.subr.mxu1 %v493_v0 }
  0x3c   :  { %341 = vmatpush3.msra.mxu0 %v79_v19  ;;  %376 = vmatpush3.msra.mxu1 %v172_v24 }
  0x3d   :  { %342 = vmatprep.subr.mxu0 %v493_v0  ;;  %377 = vmatprep.subr.mxu1 %v493_v0 }
  0x3e   :  { %343 = vmatpush3.msra.mxu0 %v78_v21  ;;  %378 = vmatpush3.msra.mxu1 %v171_v26 }
  0x3f   :  { %344 = vmatprep.subr.mxu0 %v493_v0  ;;  %379 = vmatprep.subr.mxu1 %v493_v0 }
  0x40   :  { %345 = vmatpush3.msra.mxu0 %v77_v23  ;;  %380 = vmatpush3.msra.mxu1 %v170_v28 }
  0x41   :  { %346 = vmatprep.subr.mxu0 %v493_v0  ;;  %381 = vmatprep.subr.mxu1 %v493_v0 }
  0x42   :  { %347 = vmatpush3.msra.mxu0 %v76_v25  ;;  %382 = vmatpush3.msra.mxu1 %v169_v31 }
  0x43   :  { %348 = vmatprep.subr.mxu0 %v493_v0  ;;  %383 = vmatprep.subr.mxu1 %v493_v0 }
  0x44   :  { %349 = vmatpush3.msra.mxu0 %v75_v27  ;;  %384 = vmatpush3.msra.mxu1 %v168_v32 }
  0x45   :  { %350 = vmatprep.subr.mxu0 %v493_v0  ;;  %385 = vmatprep.subr.mxu1 %v493_v0 }
  0x46   :  { %351 = vmatpush3.msra.mxu0 %v74_v29  ;;  %386 = vmatpush3.msra.mxu1 %v167_v33 }
  0x47   :  { %353 = vmatmul.mubr.f32.vlgmr.msra.gmra.mxu0 %v73_v30 }
 0x107   :  { %v156_v35 = vpop.f32.mrf.mxu0 }
 0x108   :  { %v160_v36 = vadd.f32 %v283_v34, %v156_v35 }
 0x109   :  { %v354_v37 = vpop.f32.mrf.mxu0 }
 0x10a   :  { %v166_v38 = vmax.f32 %v160_v36, 0.0 }
 0x10c   :  { %388 = vmatmul.mubr.f32.vlgmr.msra.gmra.mxu1 %v166_v38 }
 0x1cc   :  { %v256_v40 = vpop.f32.mrf.mxu1 }
 0x1cd   :  { %v257_v41 = vadd.f32 %v284_v39, %v256_v40 }
 0x1ce   :  { %v389_v42 = vpop.f32.mrf.mxu1 }
 0x1cf   :  { %v285_v43 = vmul.f32 -1.442695, %v257_v41 }
 0x1d1   :  { %398 = vpow2.f32 %v285_v43 }
 0x1de   :  { %v399_v44 = vpop.eup %398 }
 0x1df   :  { %v263_v45 = vadd.f32 1.0, %v399_v44 }
 0x1e1   :  { %400 = vrcp.f32 %v263_v45 }
 0x1ee   :  { %v401_v46 = vpop.eup %400 }
 0x1ef   :  { %266 = vst [vmem:[#allocation9] sm:$0xff] %v401_v46 }
 0x1f0   :  { %473 = shalt.err (!%p470_p5)
}
 0x1f1   :  { %276 = dma.vmem_to_hbm [thread:$0]  %s274_s12, 128, %s583_s5, [#allocation5]  }
 0x1f2   :  { %486 = dma.done.wait [#allocation5], 128  }
 0x1f3   :  { %487 = vsyncadd [#allocation5], 4294967168 }
 0x1f4   :  { %280 = vsyncpa [#allocation4], 1 }
 0x1f5   :  { %281 = vsyncpa [#allocation7], 1 }
 0x1f6   :  { %282 = vsyncpa [#allocation5], 1 }

</bundles_post_ra>
